<compile_context>
chip_gen: v7x
topology: tpu7x:2x2x1
jax: 0.10.0
libtpu: 0.0.40
codegen_flags: <defaults>
</compile_context>

<pallas_src>
import jax
import jax.numpy as jnp
from jax.experimental import pallas as pl
from jax.experimental.pallas import tpu as pltpu

BN_EPS = 1e-5

# ---- square-weight-stack row indices (each row is a (D, D) bf16 matrix, (in, out)) ----
W1, W3, W4, W5, W6, W7, W8 = range(7)
N_W_SQUARE = 7

# ---- small-parameter stack row indices (each row is a length-D f32 vector) ----
(B1, G1, BT1, B2A, B2B,
 B3, G2, BT2, B4, G3, BT3,
 B6, G4, BT4, B7, B8) = range(16)
N_SMALL = 16


# ----------------------------- kernel ------------------------------------- #
def text_fuse_g_kernel(x_ref, w_ref, w2_ref, s_ref, out_ref):
    D = out_ref.shape[-1]

    def row(i):                                   # static slice, (1, D) f32
        # Each row is used exactly once, so the implicit (1,D)->(B,D)
        # broadcast happens once per parameter; a stride-0 sublane-broadcast
        # load would shave the remaining broadcast ops but is not needed here.
        return s_ref[i:i + 1, :]

    def linear(x, wi, bi=None):
        # bf16 operands on the MXU, f32 accumulation, f32 bias add.
        y = jnp.dot(x.astype(jnp.bfloat16), w_ref[wi],
                    preferred_element_type=jnp.float32)
        if bi is not None:
            y = y + row(bi)
        return y

    def bn(x, gi, bti):
        # PyTorch training-mode BatchNorm1d: batch stats, biased variance.
        mean = jnp.mean(x, axis=0, keepdims=True)
        var = jnp.mean((x - mean) ** 2, axis=0, keepdims=True)
        return (x - mean) * jax.lax.rsqrt(var + BN_EPS) * row(gi) + row(bti)

    def relu(v):
        return jnp.maximum(v, 0.0)

    text = x_ref[0]                               # (B, D) f32
    noise = x_ref[1]                              # (B, D) f32

    # ---- from_text_latent: Lin -> ReLU -> BN -> Lin(D,2D) -> ReLU ----
    t = relu(linear(text, W1, B1))
    t = bn(t, G1, BT1)
    # Merged (D, 2D) projection: one N=256 MXU matmul; the split below lands
    # exactly on a lane-128 vreg boundary and is free.
    style = jnp.dot(t.astype(jnp.bfloat16), w2_ref[...],
                    preferred_element_type=jnp.float32)       # (B, 2D) f32
    style_add = relu(style[:, :D] + row(B2A))                 # style[:, :D]
    style_log = relu(style[:, D:] + row(B2B))                 # style[:, D:]

    # ---- from_noise: Lin -> ReLU -> BN -> Lin -> ReLU -> Lin -> BN ----
    n = relu(linear(noise, W3, B3))
    n = bn(n, G2, BT2)
    n = relu(linear(n, W4, B4))
    # W5 bias omitted: it is cancelled exactly by the following BN mean
    # subtraction (mathematically identical output, saves a load + broadcast).
    n = linear(n, W5)
    content = bn(n, G3, BT3)

    # ---- fuse (kept in f32; exp stays f32, goes to the EUP) ----
    feat = (style_add + content) * jnp.exp(style_log)

    # ---- to_image_latent: Lin -> ReLU -> BN -> Lin -> ReLU -> Lin ----
    y = relu(linear(feat, W6, B6))
    y = bn(y, G4, BT4)
    y = relu(linear(y, W7, B7))
    y = linear(y, W8, B8)

    out_ref[...] = y.astype(out_ref.dtype)


# ----------------------------- wrapper ------------------------------------ #
def text_fuse_g(text_latent, noise, params):
    w_stack, w2, small_stack = params
    B, D = text_latent.shape

    # Single (2, B, D) input: one fewer DMA descriptor/setup.
    x = jnp.stack([text_latent, noise])

    vmem = pl.BlockSpec(memory_space=pltpu.MemorySpace.VMEM)
    weight_bytes = (w_stack.size * w_stack.dtype.itemsize
                    + w2.size * w2.dtype.itemsize
                    + small_stack.size * small_stack.dtype.itemsize)
    cost = pl.CostEstimate(
        flops=2 * B * D * D * 9,                   # 7 DxD + one Dx2D matmul
        transcendentals=B * D,                     # the exp in the fuse step
        bytes_accessed=weight_bytes + 3 * B * D * 4,   # text + noise + out (f32)
    )

    return pl.pallas_call(
        text_fuse_g_kernel,
        out_shape=jax.ShapeDtypeStruct((B, D), jnp.float32),
        in_specs=[vmem, vmem, vmem, vmem],
        out_specs=vmem,
        cost_estimate=cost,
    )(x, w_stack, w2, small_stack)


# jit so repeated invocations share one compiled/fused call and the parameter
# stacks are not re-materialized by the caller each time (minimum form of P10).
text_fuse_g_jit = jax.jit(text_fuse_g)


# ---------------------- deterministic parameter setup ---------------------- #
def _spectral_normalize(w, n_iter=20):
    # w: (out, in), like nn.Linear.weight; divide by top singular value.
    u = jnp.ones((w.shape[0],), jnp.float32) / jnp.sqrt(float(w.shape[0]))
    v = None
    for _ in range(n_iter):
        v = w.T @ u
        v = v / (jnp.linalg.norm(v) + 1e-12)
        u = w @ v
        u = u / (jnp.linalg.norm(u) + 1e-12)
    sigma = u @ (w @ v)
    return w / sigma


def _linear_init(key, in_dim, out_dim):
    kw, kb = jax.random.split(key)
    bound = 1.0 / jnp.sqrt(float(in_dim))
    w = jax.random.uniform(kw, (out_dim, in_dim), jnp.float32, -bound, bound)
    b = jax.random.uniform(kb, (out_dim,), jnp.float32, -bound, bound)
    return _spectral_normalize(w), b


def make_params(key, txt_latent=128, noise_dim=128, img_latent=128):
    # Packing the square weights into one [7, D, D] stack requires equal dims
    # (true for the module's defaults 128/128/128).
    assert txt_latent == noise_dim == img_latent, (
        "packed-weight layout assumes txt_latent == noise == img_latent")
    D = img_latent
    keys = jax.random.split(key, 8)

    # from_text_latent
    w1, b1 = _linear_init(keys[0], txt_latent, txt_latent)
    # spectral norm is taken over the FULL (2D, D) matrix, as in the module
    w2, b2 = _linear_init(keys[1], txt_latent, 2 * img_latent)
    # from_noise
    w3, b3 = _linear_init(keys[2], noise_dim, img_latent)
    w4, b4 = _linear_init(keys[3], img_latent, img_latent)
    w5, _b5 = _linear_init(keys[4], img_latent, img_latent)   # b5 cancelled by BN
    # to_image_latent
    w6, b6 = _linear_init(keys[5], img_latent, img_latent)
    w7, b7 = _linear_init(keys[6], img_latent, img_latent)
    w8, b8 = _linear_init(keys[7], img_latent, img_latent)

    # Single bf16 square-weight stack, each matrix pre-transposed to (in, out).
    w_stack = jnp.stack(
        [w1.T, w3.T, w4.T, w5.T, w6.T, w7.T, w8.T]
    ).astype(jnp.bfloat16)                                    # [7, D, D]
    # Merged (D, 2D) style projection, (in, out) layout, bf16.
    w2_merged = w2.T.astype(jnp.bfloat16)                     # [D, 2D]

    ones = jnp.ones((D,), jnp.float32)
    zeros = jnp.zeros((D,), jnp.float32)
    rows = [None] * N_SMALL
    rows[B1], rows[G1], rows[BT1] = b1, ones, zeros
    rows[B2A], rows[B2B] = b2[:img_latent], b2[img_latent:]
    rows[B3], rows[G2], rows[BT2] = b3, ones, zeros
    rows[B4] = b4
    rows[G3], rows[BT3] = ones, zeros                          # (no b5: cancelled)
    rows[B6], rows[G4], rows[BT4] = b6, ones, zeros
    rows[B7], rows[B8] = b7, b8
    small_stack = jnp.stack(rows)                              # [16, D] f32

    return w_stack, w2_merged, small_stack


# ----------------------------- main ---------------------------------------- #
if __name__ == "__main__":
    D = 128        # txt_latent = noise = img_latent = 128 (module defaults)
    BATCH = 8      # small batch; BN uses full-batch training-mode statistics

    key = jax.random.PRNGKey(0)
    k_text, k_noise, k_params = jax.random.split(key, 3)

    text_latent = jax.random.normal(k_text, (BATCH, D), jnp.float32)
    noise = jax.random.normal(k_noise, (BATCH, D), jnp.float32)
    params = make_params(k_params, D, D, D)

    out = text_fuse_g_jit(text_latent, noise, params)
    out = jax.block_until_ready(out)
    assert out.shape == (BATCH, D), out.shape
    assert jnp.all(jnp.isfinite(out))
    print("KERNEL_OK")
</pallas_src>

<mosaic_0001>
module attributes {stable_mosaic.version = 11 : i64} {
  func.func @text_fuse_g_kernel(%arg0: memref<2x8x128xf32, #tpu.memory_space<vmem>>, %arg1: memref<7x128x128xbf16, #tpu.memory_space<vmem>>, %arg2: memref<128x256xbf16, #tpu.memory_space<vmem>>, %arg3: memref<16x128xf32, #tpu.memory_space<vmem>>, %arg4: memref<8x128xf32, #tpu.memory_space<vmem>>) attributes {dimension_semantics = [], scalar_prefetch = 0 : i64, scratch_operands = 0 : i64, tpu.core_type = #tpu.core_type<tc>} {
    %c0 = arith.constant 0 : index
    %c0_0 = arith.constant 0 : index
    %c0_1 = arith.constant 0 : index
    %0 = vector.load %arg0[%c0, %c0_0, %c0_1] : memref<2x8x128xf32, #tpu.memory_space<vmem>>, vector<1x8x128xf32>
    %1 = vector.shape_cast %0 : vector<1x8x128xf32> to vector<8x128xf32>
    %c1 = arith.constant 1 : index
    %c0_2 = arith.constant 0 : index
    %c0_3 = arith.constant 0 : index
    %2 = vector.load %arg0[%c1, %c0_2, %c0_3] : memref<2x8x128xf32, #tpu.memory_space<vmem>>, vector<1x8x128xf32>
    %3 = vector.shape_cast %2 : vector<1x8x128xf32> to vector<8x128xf32>
    %4 = arith.truncf %1 : vector<8x128xf32> to vector<8x128xbf16>
    %c0_4 = arith.constant 0 : index
    %c0_5 = arith.constant 0 : index
    %c0_6 = arith.constant 0 : index
    %5 = vector.load %arg1[%c0_4, %c0_5, %c0_6] : memref<7x128x128xbf16, #tpu.memory_space<vmem>>, vector<1x128x128xbf16>
    %6 = vector.shape_cast %5 : vector<1x128x128xbf16> to vector<128x128xbf16>
    %cst = arith.constant dense<0.000000e+00> : vector<8x128xf32>
    %7 = tpu.matmul %4, %6, %cst {dimension_numbers = #tpu.dot_dimension_numbers<[1], [0], [0], [1], [0, 0, 1, 1], [], []>} : vector<8x128xbf16>, vector<128x128xbf16>, vector<8x128xf32> -> vector<8x128xf32>
    %c0_7 = arith.constant 0 : index
    %c0_8 = arith.constant 0 : index
    %8 = vector.load %arg3[%c0_7, %c0_8] : memref<16x128xf32, #tpu.memory_space<vmem>>, vector<1x128xf32>
    %9 = vector.broadcast %8 : vector<1x128xf32> to vector<8x128xf32>
    %10 = arith.addf %7, %9 : vector<8x128xf32>
    %cst_9 = arith.constant 0.000000e+00 : f32
    %11 = vector.broadcast %cst_9 : f32 to vector<8x128xf32>
    %12 = arith.maximumf %10, %11 : vector<8x128xf32>
    %cst_10 = arith.constant dense<0.000000e+00> : vector<128xf32>
    %13 = vector.multi_reduction <add>, %12, %cst_10 [0] : vector<8x128xf32> to vector<128xf32>
    %14 = vector.shape_cast %13 : vector<128xf32> to vector<1x128xf32>
    %cst_11 = arith.constant 8.000000e+00 : f32
    %15 = vector.broadcast %cst_11 : f32 to vector<1x128xf32>
    %16 = arith.divf %14, %15 : vector<1x128xf32>
    %17 = vector.broadcast %16 : vector<1x128xf32> to vector<8x128xf32>
    %18 = arith.subf %12, %17 : vector<8x128xf32>
    %19 = arith.mulf %18, %18 : vector<8x128xf32>
    %cst_12 = arith.constant dense<0.000000e+00> : vector<128xf32>
    %20 = vector.multi_reduction <add>, %19, %cst_12 [0] : vector<8x128xf32> to vector<128xf32>
    %21 = vector.shape_cast %20 : vector<128xf32> to vector<1x128xf32>
    %cst_13 = arith.constant 8.000000e+00 : f32
    %22 = vector.broadcast %cst_13 : f32 to vector<1x128xf32>
    %23 = arith.divf %21, %22 : vector<1x128xf32>
    %24 = vector.broadcast %16 : vector<1x128xf32> to vector<8x128xf32>
    %25 = arith.subf %12, %24 : vector<8x128xf32>
    %cst_14 = arith.constant 9.99999974E-6 : f32
    %26 = vector.broadcast %cst_14 : f32 to vector<1x128xf32>
    %27 = arith.addf %23, %26 : vector<1x128xf32>
    %28 = math.rsqrt %27 : vector<1x128xf32>
    %29 = vector.broadcast %28 : vector<1x128xf32> to vector<8x128xf32>
    %30 = arith.mulf %25, %29 : vector<8x128xf32>
    %c1_15 = arith.constant 1 : index
    %c0_16 = arith.constant 0 : index
    %31 = vector.load %arg3[%c1_15, %c0_16] : memref<16x128xf32, #tpu.memory_space<vmem>>, vector<1x128xf32>
    %32 = vector.broadcast %31 : vector<1x128xf32> to vector<8x128xf32>
    %33 = arith.mulf %30, %32 : vector<8x128xf32>
    %c2 = arith.constant 2 : index
    %c0_17 = arith.constant 0 : index
    %34 = vector.load %arg3[%c2, %c0_17] : memref<16x128xf32, #tpu.memory_space<vmem>>, vector<1x128xf32>
    %35 = vector.broadcast %34 : vector<1x128xf32> to vector<8x128xf32>
    %36 = arith.addf %33, %35 : vector<8x128xf32>
    %37 = arith.truncf %36 : vector<8x128xf32> to vector<8x128xbf16>
    %c0_18 = arith.constant 0 : index
    %c0_19 = arith.constant 0 : index
    %38 = vector.load %arg2[%c0_18, %c0_19] : memref<128x256xbf16, #tpu.memory_space<vmem>>, vector<128x256xbf16>
    %cst_20 = arith.constant dense<0.000000e+00> : vector<8x256xf32>
    %39 = tpu.matmul %37, %38, %cst_20 {dimension_numbers = #tpu.dot_dimension_numbers<[1], [0], [0], [1], [0, 0, 1, 1], [], []>} : vector<8x128xbf16>, vector<128x256xbf16>, vector<8x256xf32> -> vector<8x256xf32>
    %40 = vector.extract_strided_slice %39 {offsets = [0, 0], sizes = [8, 128], strides = [1, 1]} : vector<8x256xf32> to vector<8x128xf32>
    %c3 = arith.constant 3 : index
    %c0_21 = arith.constant 0 : index
    %41 = vector.load %arg3[%c3, %c0_21] : memref<16x128xf32, #tpu.memory_space<vmem>>, vector<1x128xf32>
    %42 = vector.broadcast %41 : vector<1x128xf32> to vector<8x128xf32>
    %43 = arith.addf %40, %42 : vector<8x128xf32>
    %cst_22 = arith.constant 0.000000e+00 : f32
    %44 = vector.broadcast %cst_22 : f32 to vector<8x128xf32>
    %45 = arith.maximumf %43, %44 : vector<8x128xf32>
    %46 = vector.extract_strided_slice %39 {offsets = [0, 128], sizes = [8, 128], strides = [1, 1]} : vector<8x256xf32> to vector<8x128xf32>
    %c4 = arith.constant 4 : index
    %c0_23 = arith.constant 0 : index
    %47 = vector.load %arg3[%c4, %c0_23] : memref<16x128xf32, #tpu.memory_space<vmem>>, vector<1x128xf32>
    %48 = vector.broadcast %47 : vector<1x128xf32> to vector<8x128xf32>
    %49 = arith.addf %46, %48 : vector<8x128xf32>
    %cst_24 = arith.constant 0.000000e+00 : f32
    %50 = vector.broadcast %cst_24 : f32 to vector<8x128xf32>
    %51 = arith.maximumf %49, %50 : vector<8x128xf32>
    %52 = arith.truncf %3 : vector<8x128xf32> to vector<8x128xbf16>
    %c1_25 = arith.constant 1 : index
    %c0_26 = arith.constant 0 : index
    %c0_27 = arith.constant 0 : index
    %53 = vector.load %arg1[%c1_25, %c0_26, %c0_27] : memref<7x128x128xbf16, #tpu.memory_space<vmem>>, vector<1x128x128xbf16>
    %54 = vector.shape_cast %53 : vector<1x128x128xbf16> to vector<128x128xbf16>
    %cst_28 = arith.constant dense<0.000000e+00> : vector<8x128xf32>
    %55 = tpu.matmul %52, %54, %cst_28 {dimension_numbers = #tpu.dot_dimension_numbers<[1], [0], [0], [1], [0, 0, 1, 1], [], []>} : vector<8x128xbf16>, vector<128x128xbf16>, vector<8x128xf32> -> vector<8x128xf32>
    %c5 = arith.constant 5 : index
    %c0_29 = arith.constant 0 : index
    %56 = vector.load %arg3[%c5, %c0_29] : memref<16x128xf32, #tpu.memory_space<vmem>>, vector<1x128xf32>
    %57 = vector.broadcast %56 : vector<1x128xf32> to vector<8x128xf32>
    %58 = arith.addf %55, %57 : vector<8x128xf32>
    %cst_30 = arith.constant 0.000000e+00 : f32
    %59 = vector.broadcast %cst_30 : f32 to vector<8x128xf32>
    %60 = arith.maximumf %58, %59 : vector<8x128xf32>
    %cst_31 = arith.constant dense<0.000000e+00> : vector<128xf32>
    %61 = vector.multi_reduction <add>, %60, %cst_31 [0] : vector<8x128xf32> to vector<128xf32>
    %62 = vector.shape_cast %61 : vector<128xf32> to vector<1x128xf32>
    %cst_32 = arith.constant 8.000000e+00 : f32
    %63 = vector.broadcast %cst_32 : f32 to vector<1x128xf32>
    %64 = arith.divf %62, %63 : vector<1x128xf32>
    %65 = vector.broadcast %64 : vector<1x128xf32> to vector<8x128xf32>
    %66 = arith.subf %60, %65 : vector<8x128xf32>
    %67 = arith.mulf %66, %66 : vector<8x128xf32>
    %cst_33 = arith.constant dense<0.000000e+00> : vector<128xf32>
    %68 = vector.multi_reduction <add>, %67, %cst_33 [0] : vector<8x128xf32> to vector<128xf32>
    %69 = vector.shape_cast %68 : vector<128xf32> to vector<1x128xf32>
    %cst_34 = arith.constant 8.000000e+00 : f32
    %70 = vector.broadcast %cst_34 : f32 to vector<1x128xf32>
    %71 = arith.divf %69, %70 : vector<1x128xf32>
    %72 = vector.broadcast %64 : vector<1x128xf32> to vector<8x128xf32>
    %73 = arith.subf %60, %72 : vector<8x128xf32>
    %cst_35 = arith.constant 9.99999974E-6 : f32
    %74 = vector.broadcast %cst_35 : f32 to vector<1x128xf32>
    %75 = arith.addf %71, %74 : vector<1x128xf32>
    %76 = math.rsqrt %75 : vector<1x128xf32>
    %77 = vector.broadcast %76 : vector<1x128xf32> to vector<8x128xf32>
    %78 = arith.mulf %73, %77 : vector<8x128xf32>
    %c6 = arith.constant 6 : index
    %c0_36 = arith.constant 0 : index
    %79 = vector.load %arg3[%c6, %c0_36] : memref<16x128xf32, #tpu.memory_space<vmem>>, vector<1x128xf32>
    %80 = vector.broadcast %79 : vector<1x128xf32> to vector<8x128xf32>
    %81 = arith.mulf %78, %80 : vector<8x128xf32>
    %c7 = arith.constant 7 : index
    %c0_37 = arith.constant 0 : index
    %82 = vector.load %arg3[%c7, %c0_37] : memref<16x128xf32, #tpu.memory_space<vmem>>, vector<1x128xf32>
    %83 = vector.broadcast %82 : vector<1x128xf32> to vector<8x128xf32>
    %84 = arith.addf %81, %83 : vector<8x128xf32>
    %85 = arith.truncf %84 : vector<8x128xf32> to vector<8x128xbf16>
    %c2_38 = arith.constant 2 : index
    %c0_39 = arith.constant 0 : index
    %c0_40 = arith.constant 0 : index
    %86 = vector.load %arg1[%c2_38, %c0_39, %c0_40] : memref<7x128x128xbf16, #tpu.memory_space<vmem>>, vector<1x128x128xbf16>
    %87 = vector.shape_cast %86 : vector<1x128x128xbf16> to vector<128x128xbf16>
    %cst_41 = arith.constant dense<0.000000e+00> : vector<8x128xf32>
    %88 = tpu.matmul %85, %87, %cst_41 {dimension_numbers = #tpu.dot_dimension_numbers<[1], [0], [0], [1], [0, 0, 1, 1], [], []>} : vector<8x128xbf16>, vector<128x128xbf16>, vector<8x128xf32> -> vector<8x128xf32>
    %c8 = arith.constant 8 : index
    %c0_42 = arith.constant 0 : index
    %89 = vector.load %arg3[%c8, %c0_42] : memref<16x128xf32, #tpu.memory_space<vmem>>, vector<1x128xf32>
    %90 = vector.broadcast %89 : vector<1x128xf32> to vector<8x128xf32>
    %91 = arith.addf %88, %90 : vector<8x128xf32>
    %cst_43 = arith.constant 0.000000e+00 : f32
    %92 = vector.broadcast %cst_43 : f32 to vector<8x128xf32>
    %93 = arith.maximumf %91, %92 : vector<8x128xf32>
    %94 = arith.truncf %93 : vector<8x128xf32> to vector<8x128xbf16>
    %c3_44 = arith.constant 3 : index
    %c0_45 = arith.constant 0 : index
    %c0_46 = arith.constant 0 : index
    %95 = vector.load %arg1[%c3_44, %c0_45, %c0_46] : memref<7x128x128xbf16, #tpu.memory_space<vmem>>, vector<1x128x128xbf16>
    %96 = vector.shape_cast %95 : vector<1x128x128xbf16> to vector<128x128xbf16>
    %cst_47 = arith.constant dense<0.000000e+00> : vector<8x128xf32>
    %97 = tpu.matmul %94, %96, %cst_47 {dimension_numbers = #tpu.dot_dimension_numbers<[1], [0], [0], [1], [0, 0, 1, 1], [], []>} : vector<8x128xbf16>, vector<128x128xbf16>, vector<8x128xf32> -> vector<8x128xf32>
    %cst_48 = arith.constant dense<0.000000e+00> : vector<128xf32>
    %98 = vector.multi_reduction <add>, %97, %cst_48 [0] : vector<8x128xf32> to vector<128xf32>
    %99 = vector.shape_cast %98 : vector<128xf32> to vector<1x128xf32>
    %cst_49 = arith.constant 8.000000e+00 : f32
    %100 = vector.broadcast %cst_49 : f32 to vector<1x128xf32>
    %101 = arith.divf %99, %100 : vector<1x128xf32>
    %102 = vector.broadcast %101 : vector<1x128xf32> to vector<8x128xf32>
    %103 = arith.subf %97, %102 : vector<8x128xf32>
    %104 = arith.mulf %103, %103 : vector<8x128xf32>
    %cst_50 = arith.constant dense<0.000000e+00> : vector<128xf32>
    %105 = vector.multi_reduction <add>, %104, %cst_50 [0] : vector<8x128xf32> to vector<128xf32>
    %106 = vector.shape_cast %105 : vector<128xf32> to vector<1x128xf32>
    %cst_51 = arith.constant 8.000000e+00 : f32
    %107 = vector.broadcast %cst_51 : f32 to vector<1x128xf32>
    %108 = arith.divf %106, %107 : vector<1x128xf32>
    %109 = vector.broadcast %101 : vector<1x128xf32> to vector<8x128xf32>
    %110 = arith.subf %97, %109 : vector<8x128xf32>
    %cst_52 = arith.constant 9.99999974E-6 : f32
    %111 = vector.broadcast %cst_52 : f32 to vector<1x128xf32>
    %112 = arith.addf %108, %111 : vector<1x128xf32>
    %113 = math.rsqrt %112 : vector<1x128xf32>
    %114 = vector.broadcast %113 : vector<1x128xf32> to vector<8x128xf32>
    %115 = arith.mulf %110, %114 : vector<8x128xf32>
    %c9 = arith.constant 9 : index
    %c0_53 = arith.constant 0 : index
    %116 = vector.load %arg3[%c9, %c0_53] : memref<16x128xf32, #tpu.memory_space<vmem>>, vector<1x128xf32>
    %117 = vector.broadcast %116 : vector<1x128xf32> to vector<8x128xf32>
    %118 = arith.mulf %115, %117 : vector<8x128xf32>
    %c10 = arith.constant 10 : index
    %c0_54 = arith.constant 0 : index
    %119 = vector.load %arg3[%c10, %c0_54] : memref<16x128xf32, #tpu.memory_space<vmem>>, vector<1x128xf32>
    %120 = vector.broadcast %119 : vector<1x128xf32> to vector<8x128xf32>
    %121 = arith.addf %118, %120 : vector<8x128xf32>
    %122 = arith.addf %45, %121 : vector<8x128xf32>
    %123 = math.exp %51 : vector<8x128xf32>
    %124 = arith.mulf %122, %123 : vector<8x128xf32>
    %125 = arith.truncf %124 : vector<8x128xf32> to vector<8x128xbf16>
    %c4_55 = arith.constant 4 : index
    %c0_56 = arith.constant 0 : index
    %c0_57 = arith.constant 0 : index
    %126 = vector.load %arg1[%c4_55, %c0_56, %c0_57] : memref<7x128x128xbf16, #tpu.memory_space<vmem>>, vector<1x128x128xbf16>
    %127 = vector.shape_cast %126 : vector<1x128x128xbf16> to vector<128x128xbf16>
    %cst_58 = arith.constant dense<0.000000e+00> : vector<8x128xf32>
    %128 = tpu.matmul %125, %127, %cst_58 {dimension_numbers = #tpu.dot_dimension_numbers<[1], [0], [0], [1], [0, 0, 1, 1], [], []>} : vector<8x128xbf16>, vector<128x128xbf16>, vector<8x128xf32> -> vector<8x128xf32>
    %c11 = arith.constant 11 : index
    %c0_59 = arith.constant 0 : index
    %129 = vector.load %arg3[%c11, %c0_59] : memref<16x128xf32, #tpu.memory_space<vmem>>, vector<1x128xf32>
    %130 = vector.broadcast %129 : vector<1x128xf32> to vector<8x128xf32>
    %131 = arith.addf %128, %130 : vector<8x128xf32>
    %cst_60 = arith.constant 0.000000e+00 : f32
    %132 = vector.broadcast %cst_60 : f32 to vector<8x128xf32>
    %133 = arith.maximumf %131, %132 : vector<8x128xf32>
    %cst_61 = arith.constant dense<0.000000e+00> : vector<128xf32>
    %134 = vector.multi_reduction <add>, %133, %cst_61 [0] : vector<8x128xf32> to vector<128xf32>
    %135 = vector.shape_cast %134 : vector<128xf32> to vector<1x128xf32>
    %cst_62 = arith.constant 8.000000e+00 : f32
    %136 = vector.broadcast %cst_62 : f32 to vector<1x128xf32>
    %137 = arith.divf %135, %136 : vector<1x128xf32>
    %138 = vector.broadcast %137 : vector<1x128xf32> to vector<8x128xf32>
    %139 = arith.subf %133, %138 : vector<8x128xf32>
    %140 = arith.mulf %139, %139 : vector<8x128xf32>
    %cst_63 = arith.constant dense<0.000000e+00> : vector<128xf32>
    %141 = vector.multi_reduction <add>, %140, %cst_63 [0] : vector<8x128xf32> to vector<128xf32>
    %142 = vector.shape_cast %141 : vector<128xf32> to vector<1x128xf32>
    %cst_64 = arith.constant 8.000000e+00 : f32
    %143 = vector.broadcast %cst_64 : f32 to vector<1x128xf32>
    %144 = arith.divf %142, %143 : vector<1x128xf32>
    %145 = vector.broadcast %137 : vector<1x128xf32> to vector<8x128xf32>
    %146 = arith.subf %133, %145 : vector<8x128xf32>
    %cst_65 = arith.constant 9.99999974E-6 : f32
    %147 = vector.broadcast %cst_65 : f32 to vector<1x128xf32>
    %148 = arith.addf %144, %147 : vector<1x128xf32>
    %149 = math.rsqrt %148 : vector<1x128xf32>
    %150 = vector.broadcast %149 : vector<1x128xf32> to vector<8x128xf32>
    %151 = arith.mulf %146, %150 : vector<8x128xf32>
    %c12 = arith.constant 12 : index
    %c0_66 = arith.constant 0 : index
    %152 = vector.load %arg3[%c12, %c0_66] : memref<16x128xf32, #tpu.memory_space<vmem>>, vector<1x128xf32>
    %153 = vector.broadcast %152 : vector<1x128xf32> to vector<8x128xf32>
    %154 = arith.mulf %151, %153 : vector<8x128xf32>
    %c13 = arith.constant 13 : index
    %c0_67 = arith.constant 0 : index
    %155 = vector.load %arg3[%c13, %c0_67] : memref<16x128xf32, #tpu.memory_space<vmem>>, vector<1x128xf32>
    %156 = vector.broadcast %155 : vector<1x128xf32> to vector<8x128xf32>
    %157 = arith.addf %154, %156 : vector<8x128xf32>
    %158 = arith.truncf %157 : vector<8x128xf32> to vector<8x128xbf16>
    %c5_68 = arith.constant 5 : index
    %c0_69 = arith.constant 0 : index
    %c0_70 = arith.constant 0 : index
    %159 = vector.load %arg1[%c5_68, %c0_69, %c0_70] : memref<7x128x128xbf16, #tpu.memory_space<vmem>>, vector<1x128x128xbf16>
    %160 = vector.shape_cast %159 : vector<1x128x128xbf16> to vector<128x128xbf16>
    %cst_71 = arith.constant dense<0.000000e+00> : vector<8x128xf32>
    %161 = tpu.matmul %158, %160, %cst_71 {dimension_numbers = #tpu.dot_dimension_numbers<[1], [0], [0], [1], [0, 0, 1, 1], [], []>} : vector<8x128xbf16>, vector<128x128xbf16>, vector<8x128xf32> -> vector<8x128xf32>
    %c14 = arith.constant 14 : index
    %c0_72 = arith.constant 0 : index
    %162 = vector.load %arg3[%c14, %c0_72] : memref<16x128xf32, #tpu.memory_space<vmem>>, vector<1x128xf32>
    %163 = vector.broadcast %162 : vector<1x128xf32> to vector<8x128xf32>
    %164 = arith.addf %161, %163 : vector<8x128xf32>
    %cst_73 = arith.constant 0.000000e+00 : f32
    %165 = vector.broadcast %cst_73 : f32 to vector<8x128xf32>
    %166 = arith.maximumf %164, %165 : vector<8x128xf32>
    %167 = arith.truncf %166 : vector<8x128xf32> to vector<8x128xbf16>
    %c6_74 = arith.constant 6 : index
    %c0_75 = arith.constant 0 : index
    %c0_76 = arith.constant 0 : index
    %168 = vector.load %arg1[%c6_74, %c0_75, %c0_76] : memref<7x128x128xbf16, #tpu.memory_space<vmem>>, vector<1x128x128xbf16>
    %169 = vector.shape_cast %168 : vector<1x128x128xbf16> to vector<128x128xbf16>
    %cst_77 = arith.constant dense<0.000000e+00> : vector<8x128xf32>
    %170 = tpu.matmul %167, %169, %cst_77 {dimension_numbers = #tpu.dot_dimension_numbers<[1], [0], [0], [1], [0, 0, 1, 1], [], []>} : vector<8x128xbf16>, vector<128x128xbf16>, vector<8x128xf32> -> vector<8x128xf32>
    %c15 = arith.constant 15 : index
    %c0_78 = arith.constant 0 : index
    %171 = vector.load %arg3[%c15, %c0_78] : memref<16x128xf32, #tpu.memory_space<vmem>>, vector<1x128xf32>
    %172 = vector.broadcast %171 : vector<1x128xf32> to vector<8x128xf32>
    %173 = arith.addf %170, %172 : vector<8x128xf32>
    %c0_79 = arith.constant 0 : index
    %c0_80 = arith.constant 0 : index
    %174 = vector.load %arg4[%c0_79, %c0_80] : memref<8x128xf32, #tpu.memory_space<vmem>>, vector<8x128xf32>
    tpu.vector_store %arg4[%c0_79, %c0_80], %173 {strides = array<i32>} : memref<8x128xf32, #tpu.memory_space<vmem>>, vector<8x128xf32>,
    return
  }
}

</mosaic_0001>

<bundles_post_ra>
// kernel: text_fuse_g.1
= control target key start
LH: loop header
LB: loop body
LE: loop exit
PB: predicated region body
PF: predicated region fallthrough
CT: control target
= control target key end

     0   :  { %9 = vsyncpa [#allocation3], 0  ;;  %s1786_s0 = inlined_call_operand.vmem [shape: f32[2,8,128], index: 0, kind: input, shape index: {}]   ;;  %s1787_s1 = inlined_call_operand.hbm [shape: bf16[7,128,128], index: 1, kind: input, shape index: {}]   ;;  %s1788_s2 = inlined_call_operand.hbm [shape: bf16[128,256], index: 2, kind: input, shape index: {}]   ;;  %s1789_s3 = inlined_call_operand.vmem [shape: f32[16,128], index: 3, kind: input, shape index: {}]   ;;  %s1790_s4 = inlined_call_operand.hbm [shape: f32[8,128], index: 4, kind: output, shape index: {}]  }
   0x1   :  { %10 = vsyncpa [#allocation6], 0 }
   0x2   :  { %11 = vsyncpa [#allocation4], 0  ;;  %s1588_s15 = smov [#allocation2]   ;;  %s1516_s19 = scalar_lea.hbm %s1787_s1, 7168 }
   0x3   :  { %s19_s16 = sshll.u32 %s1588_s15, 4  ;;  %p1517_p0 = scmp.ne.s32.totalorder %s1787_s1, %s1516_s19  ;;  %s20_s16 = int_to_ptr.vmem [resolvable:$true] %s19_s16 }
   0x4   :  { %p1520_p1 = scmp.lt.u32.totalorder %s1516_s19, %s1787_s1 }
   0x6   :  { %p1522_p2 = pnand %p1520_p1, %p1517_p0 }
   0x8   :  { %1525 = shalt.err (!%p1522_p2)
}
   0x9   :  { %s1526_s24 = scalar_lea.vmem %s20_s16, 7168  ;;  %p1531_p4 = scmp.lt.s32.totalorder %s20_s16, %s20_s16 }
   0xa   :  { %p1527_p3 = scmp.ne.s32.totalorder %s20_s16, %s1526_s24  ;;  %p1532_p5 = scmp.lt.s32.totalorder %s1526_s24, %s1526_s24 }
   0xc   :  { %p1533_p6 = por %p1532_p5, %p1531_p4 }
   0xe   :  { %p1534_p7 = pnand %p1533_p6, %p1527_p3 }
  0x10   :  { %1537 = shalt.err (!%p1534_p7)
}
  0x11   :  { %s1589_s25 = smov 64   ;;  %s1590_s26 = smov 4  }
  0x12   :  { %25 = dma.hbm_to_vmem [thread:$0]  %s1787_s1, 7168, %s20_s16, [#allocation3], %s1589_s25, %s1589_s25, %s1590_s26  }
  0x13   :  { %s1591_s29 = smov [#allocation5]   ;;  %s1538_s7 = scalar_lea.hbm %s1788_s2, 2048 }
  0x14   :  { %s31_s30 = sshll.u32 %s1591_s29, 4  ;;  %p1539_p8 = scmp.ne.s32.totalorder %s1788_s2, %s1538_s7  ;;  %s32_s30 = int_to_ptr.vmem [resolvable:$true] %s31_s30 }
  0x15   :  { %p1542_p9 = scmp.lt.u32.totalorder %s1538_s7, %s1788_s2 }
  0x17   :  { %p1544_p10 = pnand %p1542_p9, %p1539_p8 }
  0x19   :  { %1547 = shalt.err (!%p1544_p10)
}
  0x1a   :  { %s1548_s12 = scalar_lea.vmem %s32_s30, 2048  ;;  %p1553_p12 = scmp.lt.s32.totalorder %s32_s30, %s32_s30 }
  0x1b   :  { %p1549_p11 = scmp.ne.s32.totalorder %s32_s30, %s1548_s12  ;;  %p1554_p13 = scmp.lt.s32.totalorder %s1548_s12, %s1548_s12 }
  0x1d   :  { %p1555_p0 = por %p1554_p13, %p1553_p12 }
  0x1f   :  { %p1556_p1 = pnand %p1555_p0, %p1549_p11 }
  0x21   :  { %1559 = shalt.err (!%p1556_p1)
}
  0x22   :  { %s1592_s1 = smov 128   ;;  %s1593_s13 = smov 8  }
  0x23   :  { %37 = dma.hbm_to_vmem [thread:$0]  %s1788_s2, 2048, %s32_s30, [#allocation6], %s1592_s1, %s1592_s1, %s1593_s13  }
  0x24   :  { %1582 = dma.done.wait [#allocation3], 7168  }
  0x25   :  { %1583 = vsyncadd [#allocation3], 4294960128 }
  0x26   :  { %1584 = dma.done.wait [#allocation6], 2048  }
  0x27   :  { %1585 = vsyncadd [#allocation6], 4294965248  ;;  %v1594_v0 = vmov 0.0   ;;  %vm1595_vm0 = vmmov 0   ;;  %v1426_v1 = vld [vmem:[#allocation2] sm:$0xff]   ;;  %v1427_v2 = vld [vmem:[#allocation2 + $0x8] sm:$0xff]  }
  0x28   :  { %1276 = vmatprep.subr.bf16.mxu0 %v1594_v0  ;;  %1292 = vmatprep.mubr.msk.bf16.mxu0 %vm1595_vm0, %v1594_v0  ;;  %v1428_v3 = vld [vmem:[#allocation2 + $0x10] sm:$0xff]   ;;  %v1429_v4 = vld [vmem:[#allocation2 + $0x18] sm:$0xff]   ;;  %v1430_v5 = vld [vmem:[#allocation2 + $0x20] sm:$0xff]   ;;  %v1596_v37 = vmov 0   ;;  %s1597_s21 = smov [#allocation7]  }
  0x29   :  { %1277 = vmatpush3.bf16.msra.mxu0 %v1426_v1  ;;  %v1431_v6 = vld [vmem:[#allocation2 + $0x28] sm:$0xff]   ;;  %v1432_v7 = vld [vmem:[#allocation2 + $0x30] sm:$0xff]   ;;  %v1433_v8 = vld [vmem:[#allocation2 + $0x38] sm:$0xff]   ;;  %322 = vmatprep.mubr.bf16.mxu1 %v1596_v37  ;;  %s1114_s22 = sshll.u32 %s1597_s21, 4  ;;  %s1115_s22 = int_to_ptr.vmem [resolvable:$true] %s1114_s22 }
  0x2a   :  { %1278 = vmatprep.subr.bf16.mxu0 %v1594_v0  ;;  %v47_v9 = vld [vmem:[%s1786_s0] sm:$0xff]  ;;  %v1435_v12 = vld [vmem:[#allocation2 + $0x48] sm:$0xff]   ;;  %v1436_v13 = vld [vmem:[#allocation2 + $0x50] sm:$0xff]   ;;  %s1560_s23 = scalar_lea.vmem %s1115_s22, 128  ;;  %p1565_p3 = scmp.lt.s32.totalorder %s1115_s22, %s1115_s22 }
  0x2b   :  { %v1434_v10 = vld [vmem:[#allocation2 + $0x40] sm:$0xff]   ;;  %v50_v11 = vpack.c.bf16 %v47_v9, %v47_v9  ;;  %v1437_v14 = vld [vmem:[#allocation2 + $0x58] sm:$0xff]   ;;  %v1439_v16 = vld [vmem:[#allocation2 + $0x68] sm:$0xff]   ;;  %p1561_p2 = scmp.ne.s32.totalorder %s1115_s22, %s1560_s23  ;;  %p1566_p4 = scmp.lt.s32.totalorder %s1560_s23, %s1560_s23 }
  0x2c   :  { %v1438_v15 = vld [vmem:[#allocation2 + $0x60] sm:$0xff]   ;;  %v1440_v17 = vld [vmem:[#allocation2 + $0x70] sm:$0xff]   ;;  %v1441_v18 = vld [vmem:[#allocation2 + $0x78] sm:$0xff]  }
  0x2d   :  { %1279 = vmatpush3.bf16.msra.mxu0 %v1427_v2  ;;  %v1124_v19 = vld [vmem:[%s1786_s0 + $0x8] sm:$0xff]  ;;  %v1445_v23 = vld [vmem:[#allocation5 + $0x14] ss:$8 sps:$4 sm:$0xff]   ;;  %v1447_v24 = vld [vmem:[#allocation5 + $0x10] ss:$8 sps:$4 sm:$0xff]   ;;  %p1567_p5 = por %p1566_p4, %p1565_p3 }
  0x2e   :  { %1280 = vmatprep.subr.bf16.mxu0 %v1594_v0  ;;  %v345_v20 = vpack.c.bf16 %v1124_v19, %v1124_v19  ;;  %v1442_v21 = vld [vmem:[#allocation5 + $0x4] ss:$8 sps:$4 sm:$0xff]   ;;  %v1444_v22 = vld [vmem:[#allocation5] ss:$8 sps:$4 sm:$0xff]   ;;  %v1451_v27 = vld [vmem:[#allocation5 + $0x34] ss:$8 sps:$4 sm:$0xff]  }
  0x2f   :  { %290 = vmatprep.subr.bf16.mxu1 %v1442_v21  ;;  %v1448_v25 = vld [vmem:[#allocation5 + $0x24] ss:$8 sps:$4 sm:$0xff]   ;;  %v1450_v26 = vld [vmem:[#allocation5 + $0x20] ss:$8 sps:$4 sm:$0xff]   ;;  %v1453_v28 = vld [vmem:[#allocation5 + $0x30] ss:$8 sps:$4 sm:$0xff]   ;;  %p1568_p6 = pnand %p1567_p5, %p1561_p2 }
  0x30   :  { %291 = vmatpush1.bf16.msra.mxu1 %v1444_v22  ;;  %v1454_v29 = vld [vmem:[#allocation5 + $0x44] ss:$8 sps:$4 sm:$0xff]   ;;  %v1456_v30 = vld [vmem:[#allocation5 + $0x40] ss:$8 sps:$4 sm:$0xff]   ;;  %v1457_v31 = vld [vmem:[#allocation5 + $0x54] ss:$8 sps:$4 sm:$0xff]  }
  0x31   :  { %1281 = vmatpush3.bf16.msra.mxu0 %v1428_v3  ;;  %292 = vmatprep.subr.bf16.mxu1 %v1445_v23  ;;  %v1459_v32 = vld [vmem:[#allocation5 + $0x50] ss:$8 sps:$4 sm:$0xff]   ;;  %v1460_v33 = vld [vmem:[#allocation5 + $0x64] ss:$8 sps:$4 sm:$0xff]   ;;  %v1462_v34 = vld [vmem:[#allocation5 + $0x60] ss:$8 sps:$4 sm:$0xff]  }
  0x32   :  { %1282 = vmatprep.subr.bf16.mxu0 %v1594_v0  ;;  %v1463_v35 = vld [vmem:[#allocation5 + $0x74] ss:$8 sps:$4 sm:$0xff]   ;;  %v1465_v36 = vld [vmem:[#allocation5 + $0x70] ss:$8 sps:$4 sm:$0xff]   ;;  %v1125_v38 = vld [vmem:[%s1789_s3] ss:$0 sm:$0xff] }
  0x33   :  { %v1154_v58 = vld [vmem:[%s1789_s3 + $0x5] ss:$0 sm:$0xff] }
  0x34   :  { %293 = vmatpush1.bf16.msra.mxu1 %v1447_v24  ;;  %v1466_v22 = vld [vmem:[#allocation2 + $0x80] sm:$0xff]  }
  0x35   :  { %1283 = vmatpush3.bf16.msra.mxu0 %v1429_v4  ;;  %294 = vmatprep.subr.bf16.mxu1 %v1448_v25 }
  0x36   :  { %1284 = vmatprep.subr.bf16.mxu0 %v1594_v0 }
  0x38   :  { %295 = vmatpush1.bf16.msra.mxu1 %v1450_v26  ;;  %v1467_v26 = vld [vmem:[#allocation2 + $0x88] sm:$0xff]  }
  0x39   :  { %1285 = vmatpush3.bf16.msra.mxu0 %v1430_v5  ;;  %296 = vmatprep.subr.bf16.mxu1 %v1451_v27 }
  0x3a   :  { %1286 = vmatprep.subr.bf16.mxu0 %v1594_v0 }
  0x3c   :  { %297 = vmatpush1.bf16.msra.mxu1 %v1453_v28 }
  0x3d   :  { %1287 = vmatpush3.bf16.msra.mxu0 %v1431_v6  ;;  %298 = vmatprep.subr.bf16.mxu1 %v1454_v29  ;;  %v1468_v29 = vld [vmem:[#allocation2 + $0x90] sm:$0xff]  }
  0x3e   :  { %1288 = vmatprep.subr.bf16.mxu0 %v1594_v0 }
  0x40   :  { %299 = vmatpush1.bf16.msra.mxu1 %v1456_v30 }
  0x41   :  { %1289 = vmatpush3.bf16.msra.mxu0 %v1432_v7  ;;  %300 = vmatprep.subr.bf16.mxu1 %v1457_v31 }
  0x42   :  { %1290 = vmatprep.subr.bf16.mxu0 %v1594_v0 }
  0x44   :  { %301 = vmatpush1.bf16.msra.mxu1 %v1459_v32  ;;  %v1469_v32 = vld [vmem:[#allocation2 + $0x98] sm:$0xff]  }
  0x45   :  { %1291 = vmatpush3.bf16.msra.mxu0 %v1433_v8  ;;  %302 = vmatprep.subr.bf16.mxu1 %v1460_v33 }
  0x46   :  { %1296 = vmatprep.subr.bf16.mxu0 %v1594_v0 }
  0x48   :  { %1293 = vmatmul.mubr.bf16.vlgmr.msra.gmra.mrb[0].mxu0 %v50_v11  ;;  %303 = vmatpush1.bf16.msra.mxu1 %v1462_v34  ;;  %v1470_v34 = vld [vmem:[#allocation2 + $0xa0] sm:$0xff]  }
  0x49   :  { %1297 = vmatpush3.bf16.msra.mxu0 %v1434_v10  ;;  %1312 = vmatprep.mubr.msk.bf16.mxu0 %vm1595_vm0, %v1594_v0 }
  0x4a   :  { %1298 = vmatprep.subr.bf16.mxu0 %v1594_v0  ;;  %304 = vmatprep.subr.bf16.mxu1 %v1463_v35  ;;  %v1471_v35 = vld [vmem:[#allocation2 + $0xa8] sm:$0xff]  }
  0x4c   :  { %305 = vmatpush1.bf16.msra.mxu1 %v1465_v36  ;;  %v1472_v36 = vld [vmem:[#allocation2 + $0xb0] sm:$0xff]  }
  0x4d   :  { %1299 = vmatpush3.bf16.msra.mxu0 %v1435_v12  ;;  %1316 = vmatprep.subr.bf16.mxu1 %v1594_v0 }
  0x4e   :  { %1300 = vmatprep.subr.bf16.mxu0 %v1594_v0 }
  0x51   :  { %1301 = vmatpush3.bf16.msra.mxu0 %v1436_v13 }
  0x52   :  { %1302 = vmatprep.subr.bf16.mxu0 %v1594_v0 }
  0x55   :  { %1303 = vmatpush3.bf16.msra.mxu0 %v1437_v14  ;;  %v1134_v14 = vld [vmem:[%s1789_s3 + $0x1] ss:$0 sm:$0xff] }
  0x56   :  { %1304 = vmatprep.subr.bf16.mxu0 %v1594_v0 }
  0x59   :  { %1305 = vmatpush3.bf16.msra.mxu0 %v1438_v15 }
  0x5a   :  { %1306 = vmatprep.subr.bf16.mxu0 %v1594_v0 }
  0x5d   :  { %1307 = vmatpush3.bf16.msra.mxu0 %v1439_v16 }
  0x5e   :  { %1308 = vmatprep.subr.bf16.mxu0 %v1594_v0 }
  0x61   :  { %1309 = vmatpush3.bf16.msra.mxu0 %v1440_v17  ;;  %v1135_v17 = vld [vmem:[%s1789_s3 + $0x2] ss:$0 sm:$0xff] }
  0x62   :  { %1310 = vmatprep.subr.bf16.mxu0 %v1594_v0 }
  0x65   :  { %1311 = vmatpush3.bf16.msra.mxu0 %v1441_v18 }
  0x66   :  { %1336 = vmatprep.subr.bf16.mxu0 %v1594_v0 }
  0x68   :  { %1313 = vmatmul.mubr.bf16.vlgmr.msra.gmra.mrb[4].mxu0 %v345_v20 }
  0x69   :  { %1352 = vmatprep.mubr.msk.bf16.mxu0 %vm1595_vm0, %v1594_v0 }
 0x11b   :  { %v154_v39 = vpop.f32.mrb[0].mxu0 }
 0x11c   :  { %v155_v40 = vadd.f32 %v1125_v38, %v154_v39  ;;  %v1294_v41 = vpop.f32.mrb[1].mxu0  ;;  %v1163_v38 = vld [vmem:[%s1789_s3 + $0x6] ss:$0 sm:$0xff] }
 0x11d   :  { %v157_v42 = vpop.f32.mrb[2].mxu0  ;;  %v1164_v41 = vld [vmem:[%s1789_s3 + $0x7] ss:$0 sm:$0xff] }
 0x11e   :  { %v160_v43 = vmax.f32 %v155_v40, 0.0  ;;  %v1295_v44 = vpop.f32.mrb[3].mxu0  ;;  %v1473_v40 = vld [vmem:[#allocation2 + $0xb8] sm:$0xff]  }
 0x120   :  { %v161_v45 = vrot.slane %v160_v43, 4 }
 0x122   :  { %v162_v46 = vadd.f32 %v161_v45, %v160_v43  ;;  %v1474_v45 = vld [vmem:[#allocation2 + $0xc0] sm:$0xff]  }
 0x123   :  { %1337 = vmatpush3.bf16.msra.mxu0 %v1474_v45 }
 0x124   :  { %v163_v47 = vrot.slane %v162_v46, 2  ;;  %1338 = vmatprep.subr.bf16.mxu0 %v1594_v0 }
 0x126   :  { %v164_v48 = vadd.f32 %v163_v47, %v162_v46  ;;  %v1475_v46 = vld [vmem:[#allocation2 + $0xc8] sm:$0xff]   ;;  %v1476_v47 = vld [vmem:[#allocation2 + $0xd0] sm:$0xff]  }
 0x127   :  { %1339 = vmatpush3.bf16.msra.mxu0 %v1475_v46 }
 0x128   :  { %v165_v49 = vrot.slane %v164_v48, 1  ;;  %1340 = vmatprep.subr.bf16.mxu0 %v1594_v0 }
 0x12a   :  { %v166_v50 = vadd.f32 %v165_v49, %v164_v48  ;;  %v1477_v48 = vld [vmem:[#allocation2 + $0xd8] sm:$0xff]   ;;  %v1478_v49 = vld [vmem:[#allocation2 + $0xe0] sm:$0xff]  }
 0x12b   :  { %1341 = vmatpush3.bf16.msra.mxu0 %v1476_v47 }
 0x12c   :  { %v168_v51 = vmul.f32 0.125, %v166_v50  ;;  %1342 = vmatprep.subr.bf16.mxu0 %v1594_v0  ;;  %v1479_v50 = vld [vmem:[#allocation2 + $0xe8] sm:$0xff]  }
 0x12e   :  { %v169_v52 = vsub.f32 %v160_v43, %v168_v51  ;;  %v1480_v51 = vld [vmem:[#allocation2 + $0xf0] sm:$0xff]  }
 0x12f   :  { %1343 = vmatpush3.bf16.msra.mxu0 %v1477_v48  ;;  %v1490_v48 = vld [vmem:[#allocation2 + $0x140] sm:$0xff]  }
 0x130   :  { %v170_v53 = vmul.f32 %v169_v52, %v169_v52  ;;  %1344 = vmatprep.subr.bf16.mxu0 %v1594_v0 }
 0x132   :  { %v171_v54 = vrot.slane %v170_v53, 4 }
 0x133   :  { %1345 = vmatpush3.bf16.msra.mxu0 %v1478_v49  ;;  %v1491_v49 = vld [vmem:[#allocation2 + $0x148] sm:$0xff]  }
 0x134   :  { %v172_v55 = vadd.f32 %v171_v54, %v170_v53  ;;  %1346 = vmatprep.subr.bf16.mxu0 %v1594_v0 }
 0x136   :  { %v173_v56 = vrot.slane %v172_v55, 2 }
 0x137   :  { %1347 = vmatpush3.bf16.msra.mxu0 %v1479_v50  ;;  %v1492_v50 = vld [vmem:[#allocation2 + $0x150] sm:$0xff]  }
 0x138   :  { %v174_v57 = vadd.f32 %v173_v56, %v172_v55  ;;  %1348 = vmatprep.subr.bf16.mxu0 %v1594_v0 }
 0x13a   :  { %v175_v59 = vrot.slane %v174_v57, 1 }
 0x13b   :  { %v450_v60 = vpop.f32.mrb[4].mxu0  ;;  %1349 = vmatpush3.bf16.msra.mxu0 %v1480_v51  ;;  %v1493_v51 = vld [vmem:[#allocation2 + $0x158] sm:$0xff]  }
 0x13c   :  { %v176_v61 = vadd.f32 %v175_v59, %v174_v57  ;;  %v451_v62 = vadd.f32 %v1154_v58, %v450_v60  ;;  %v1314_v63 = vpop.f32.mrb[5].mxu0  ;;  %1350 = vmatprep.subr.bf16.mxu0 %v1594_v0  ;;  %v1165_v57 = vld [vmem:[%s1789_s3 + $0x8] ss:$0 sm:$0xff] }
 0x13d   :  { %v453_v1 = vpop.f32.mrb[6].mxu0 }
 0x13e   :  { %v177_v2 = vmul.f32 0.125, %v176_v61  ;;  %v456_v3 = vmax.f32 %v451_v62, 0.0  ;;  %v1315_v4 = vpop.f32.mrb[7].mxu0 }
 0x13f   :  { %v1484_v4 = vld [vmem:[#allocation2 + $0x110] sm:$0xff]  }
 0x140   :  { %v178_v5 = vadd.f32 1e-05, %v177_v2  ;;  %v457_v6 = vrot.slane %v456_v3, 4  ;;  %v1482_v2 = vld [vmem:[#allocation2 + $0x100] sm:$0xff]  }
 0x142   :  { %1506 = vrsqrt.f32 %v178_v5  ;;  %v458_v7 = vadd.f32 %v457_v6, %v456_v3  ;;  %v1485_v5 = vld [vmem:[#allocation2 + $0x118] sm:$0xff]   ;;  %v1486_v6 = vld [vmem:[#allocation2 + $0x120] sm:$0xff]  }
 0x144   :  { %v459_v8 = vrot.slane %v458_v7, 2 }
 0x146   :  { %v460_v9 = vadd.f32 %v459_v8, %v458_v7  ;;  %v1487_v7 = vld [vmem:[#allocation2 + $0x128] sm:$0xff]   ;;  %v1488_v8 = vld [vmem:[#allocation2 + $0x130] sm:$0xff]  }
 0x148   :  { %v461_v10 = vrot.slane %v460_v9, 1 }
 0x14a   :  { %v462_v11 = vadd.f32 %v461_v10, %v460_v9  ;;  %v1489_v9 = vld [vmem:[#allocation2 + $0x138] sm:$0xff]  }
 0x14c   :  { %v1507_v12 = vpop.eup %1506  ;;  %v463_v13 = vmul.f32 0.125, %v462_v11 }
 0x14d   :  { %v180_v15 = vmul.f32 %v1507_v12, %v169_v52  ;;  %v1481_v52 = vld [vmem:[#allocation2 + $0xf8] sm:$0xff]  }
 0x14e   :  { %v464_v16 = vsub.f32 %v456_v3, %v463_v13  ;;  %1351 = vmatpush3.bf16.msra.mxu0 %v1481_v52  ;;  %v1483_v3 = vld [vmem:[#allocation2 + $0x108] sm:$0xff]   ;;  %v1494_v52 = vld [vmem:[#allocation2 + $0x160] sm:$0xff]  }
 0x14f   :  { %v186_v18 = vmul.f32 %v1134_v14, %v180_v15  ;;  %1376 = vmatprep.subr.bf16.mxu0 %v1594_v0 }
 0x150   :  { %v465_v19 = vmul.f32 %v464_v16, %v464_v16 }
 0x151   :  { %v192_v20 = vadd.f32 %v1135_v17, %v186_v18 }
 0x152   :  { %v466_v21 = vrot.slane %v465_v19, 4 }
 0x153   :  { %v193_v23 = vpack.c.bf16 %v192_v20, %v192_v20 }
 0x154   :  { %v467_v24 = vadd.f32 %v466_v21, %v465_v19 }
 0x155   :  { %323 = vmatmul.mubr.bf16.vlgmr.msra.gmra.mrb[0].mxu1 %v193_v23 }
 0x156   :  { %v468_v25 = vrot.slane %v467_v24, 2  ;;  %1317 = vmatpush3.bf16.msra.mxu1 %v1466_v22  ;;  %1332 = vmatprep.mubr.msk.bf16.mxu1 %vm1595_vm0, %v1594_v0 }
 0x157   :  { %1318 = vmatprep.subr.bf16.mxu1 %v1594_v0 }
 0x158   :  { %v469_v27 = vadd.f32 %v468_v25, %v467_v24 }
 0x15a   :  { %v470_v28 = vrot.slane %v469_v27, 1  ;;  %1319 = vmatpush3.bf16.msra.mxu1 %v1467_v26 }
 0x15b   :  { %1320 = vmatprep.subr.bf16.mxu1 %v1594_v0 }
 0x15c   :  { %v471_v30 = vadd.f32 %v470_v28, %v469_v27  ;;  %v1153_v28 = vld [vmem:[%s1789_s3 + $0x4] ss:$0 sm:$0xff] }
 0x15e   :  { %v472_v31 = vmul.f32 0.125, %v471_v30  ;;  %1321 = vmatpush3.bf16.msra.mxu1 %v1468_v29 }
 0x15f   :  { %1322 = vmatprep.subr.bf16.mxu1 %v1594_v0 }
 0x160   :  { %v473_v33 = vadd.f32 1e-05, %v472_v31 }
 0x162   :  { %1508 = vrsqrt.f32 %v473_v33  ;;  %1323 = vmatpush3.bf16.msra.mxu1 %v1469_v32 }
 0x163   :  { %1324 = vmatprep.subr.bf16.mxu1 %v1594_v0 }
 0x166   :  { %1325 = vmatpush3.bf16.msra.mxu1 %v1470_v34 }
 0x167   :  { %1326 = vmatprep.subr.bf16.mxu1 %v1594_v0 }
 0x16a   :  { %1327 = vmatpush3.bf16.msra.mxu1 %v1471_v35  ;;  %v1152_v35 = vld [vmem:[%s1789_s3 + $0x3] ss:$0 sm:$0xff] }
 0x16b   :  { %1328 = vmatprep.subr.bf16.mxu1 %v1594_v0 }
 0x16c   :  { %v1509_v37 = vpop.eup %1508 }
 0x16d   :  { %v475_v39 = vmul.f32 %v1509_v37, %v464_v16  ;;  %v1182_v37 = vld [vmem:[%s1789_s3 + $0x9] ss:$0 sm:$0xff] }
 0x16e   :  { %1329 = vmatpush3.bf16.msra.mxu1 %v1472_v36 }
 0x16f   :  { %v481_v42 = vmul.f32 %v1163_v38, %v475_v39  ;;  %1330 = vmatprep.subr.bf16.mxu1 %v1594_v0 }
 0x171   :  { %v487_v43 = vadd.f32 %v1164_v41, %v481_v42 }
 0x172   :  { %1331 = vmatpush3.bf16.msra.mxu1 %v1473_v40  ;;  %v1183_v40 = vld [vmem:[%s1789_s3 + $0xa] ss:$0 sm:$0xff] }
 0x173   :  { %v488_v44 = vpack.c.bf16 %v487_v43, %v487_v43  ;;  %1356 = vmatprep.subr.bf16.mxu1 %v1594_v0 }
 0x175   :  { %1333 = vmatmul.mubr.bf16.vlgmr.msra.gmra.mrb[4].mxu1 %v488_v44 }
 0x176   :  { %1372 = vmatprep.mubr.msk.bf16.mxu1 %vm1595_vm0, %v1594_v0  ;;  %1357 = vmatpush3.bf16.msra.mxu1 %v1482_v2 }
 0x177   :  { %1358 = vmatprep.subr.bf16.mxu1 %v1594_v0 }
 0x17a   :  { %1359 = vmatpush3.bf16.msra.mxu1 %v1483_v3 }
 0x17b   :  { %1360 = vmatprep.subr.bf16.mxu1 %v1594_v0 }
 0x17e   :  { %1361 = vmatpush3.bf16.msra.mxu1 %v1484_v4 }
 0x17f   :  { %1362 = vmatprep.subr.bf16.mxu1 %v1594_v0 }
 0x182   :  { %1363 = vmatpush3.bf16.msra.mxu1 %v1485_v5 }
 0x183   :  { %1364 = vmatprep.subr.bf16.mxu1 %v1594_v0 }
 0x186   :  { %1365 = vmatpush3.bf16.msra.mxu1 %v1486_v6 }
 0x187   :  { %1366 = vmatprep.subr.bf16.mxu1 %v1594_v0 }
 0x18a   :  { %1367 = vmatpush3.bf16.msra.mxu1 %v1487_v7 }
 0x18b   :  { %1368 = vmatprep.subr.bf16.mxu1 %v1594_v0 }
 0x18e   :  { %1369 = vmatpush3.bf16.msra.mxu1 %v1488_v8 }
 0x18f   :  { %1370 = vmatprep.subr.bf16.mxu1 %v1594_v0 }
 0x192   :  { %1371 = vmatpush3.bf16.msra.mxu1 %v1489_v9 }
 0x193   :  { %1396 = vmatprep.subr.bf16.mxu1 %v1594_v0 }
 0x228   :  { %v1715_v53 = vpop.f32.mrb[0].mxu1 }
 0x229   :  { %v326_v54 = vpop.f32.mrb[1].mxu1  ;;  %v336_v38 = vadd.f32 %v1152_v35, %v1715_v53  ;;  %v1495_v53 = vld [vmem:[#allocation2 + $0x168] sm:$0xff]  }
 0x22a   :  { %v328_v55 = vpop.f32.mrb[2].mxu1  ;;  %v343_v30 = vadd.f32 %v1153_v28, %v326_v54  ;;  %v1496_v54 = vld [vmem:[#allocation2 + $0x170] sm:$0xff]  }
 0x22b   :  { %v329_v56 = vpop.f32.mrb[3].mxu1  ;;  %v337_v42 = vmax.f32 %v336_v38, 0.0  ;;  %v1497_v55 = vld [vmem:[#allocation2 + $0x178] sm:$0xff]  }
 0x22c   :  { %v344_v33 = vmax.f32 %v343_v30, 0.0  ;;  %v1498_v56 = vld [vmem:[#allocation2 + $0x180] sm:$0xff]   ;;  %v1504_v30 = vld [vmem:[#allocation2 + $0x1b0] sm:$0xff]  }
 0x22e   :  { %v738_v34 = vmul.f32 1.442695, %v344_v33 }
 0x248   :  { %v593_v58 = vpop.f32.mrb[4].mxu1 }
 0x249   :  { %v594_v59 = vadd.f32 %v1165_v57, %v593_v58  ;;  %v1334_v60 = vpop.f32.mrb[5].mxu1  ;;  %v1499_v57 = vld [vmem:[#allocation2 + $0x188] sm:$0xff]   ;;  %v1500_v58 = vld [vmem:[#allocation2 + $0x190] sm:$0xff]  }
 0x24a   :  { %v596_v61 = vpop.f32.mrb[6].mxu1  ;;  %v1502_v60 = vld [vmem:[#allocation2 + $0x1a0] sm:$0xff]  }
 0x24b   :  { %v599_v62 = vmax.f32 %v594_v59, 0.0  ;;  %v1335_v63 = vpop.f32.mrb[7].mxu1  ;;  %v1501_v59 = vld [vmem:[#allocation2 + $0x198] sm:$0xff]   ;;  %v1503_v61 = vld [vmem:[#allocation2 + $0x1a8] sm:$0xff]  }
 0x24d   :  { %v600_v1 = vpack.c.bf16 %v599_v62, %v599_v62  ;;  %v1184_v62 = vld [vmem:[%s1789_s3 + $0xb] ss:$0 sm:$0xff] }
 0x24f   :  { %1353 = vmatmul.mubr.bf16.vlgmr.msra.gmra.mrb[8].mxu0 %v600_v1 }
 0x250   :  { %1392 = vmatprep.mubr.msk.bf16.mxu0 %vm1595_vm0, %v1594_v0  ;;  %1377 = vmatpush3.bf16.msra.mxu0 %v1490_v48 }
 0x251   :  { %1378 = vmatprep.subr.bf16.mxu0 %v1594_v0 }
 0x254   :  { %1379 = vmatpush3.bf16.msra.mxu0 %v1491_v49 }
 0x255   :  { %1380 = vmatprep.subr.bf16.mxu0 %v1594_v0 }
 0x258   :  { %1381 = vmatpush3.bf16.msra.mxu0 %v1492_v50 }
 0x259   :  { %1382 = vmatprep.subr.bf16.mxu0 %v1594_v0 }
 0x25c   :  { %1383 = vmatpush3.bf16.msra.mxu0 %v1493_v51 }
 0x25d   :  { %1384 = vmatprep.subr.bf16.mxu0 %v1594_v0 }
 0x260   :  { %1385 = vmatpush3.bf16.msra.mxu0 %v1494_v52 }
 0x261   :  { %1386 = vmatprep.subr.bf16.mxu0 %v1594_v0 }
 0x264   :  { %1387 = vmatpush3.bf16.msra.mxu0 %v1495_v53 }
 0x265   :  { %1388 = vmatprep.subr.bf16.mxu0 %v1594_v0 }
 0x268   :  { %1389 = vmatpush3.bf16.msra.mxu0 %v1496_v54 }
 0x269   :  { %1390 = vmatprep.subr.bf16.mxu0 %v1594_v0 }
 0x26c   :  { %1391 = vmatpush3.bf16.msra.mxu0 %v1497_v55 }
 0x322   :  { %v700_v10 = vpop.f32.mrb[8].mxu0 }
 0x323   :  { %v706_v11 = vrot.slane %v700_v10, 4  ;;  %v1354_v12 = vpop.f32.mrb[9].mxu0 }
 0x324   :  { %v703_v13 = vpop.f32.mrb[10].mxu0 }
 0x325   :  { %v707_v14 = vadd.f32 %v706_v11, %v700_v10  ;;  %v1355_v15 = vpop.f32.mrb[11].mxu0 }
 0x327   :  { %v708_v16 = vrot.slane %v707_v14, 2 }
 0x329   :  { %v709_v17 = vadd.f32 %v708_v16, %v707_v14 }
 0x32b   :  { %v710_v18 = vrot.slane %v709_v17, 1 }
 0x32d   :  { %v711_v19 = vadd.f32 %v710_v18, %v709_v17 }
 0x32f   :  { %v712_v20 = vmul.f32 0.125, %v711_v19 }
 0x331   :  { %v713_v21 = vsub.f32 %v700_v10, %v712_v20 }
 0x333   :  { %v714_v22 = vmul.f32 %v713_v21, %v713_v21 }
 0x335   :  { %v715_v23 = vrot.slane %v714_v22, 4 }
 0x337   :  { %v716_v24 = vadd.f32 %v715_v23, %v714_v22 }
 0x339   :  { %v717_v25 = vrot.slane %v716_v24, 2 }
 0x33b   :  { %v718_v26 = vadd.f32 %v717_v25, %v716_v24  ;;  %v1193_v24 = vld [vmem:[%s1789_s3 + $0xc] ss:$0 sm:$0xff] }
 0x33d   :  { %v719_v27 = vrot.slane %v718_v26, 1 }
 0x33f   :  { %v720_v29 = vadd.f32 %v719_v27, %v718_v26  ;;  %v1194_v26 = vld [vmem:[%s1789_s3 + $0xd] ss:$0 sm:$0xff] }
 0x341   :  { %v721_v31 = vmul.f32 0.125, %v720_v29 }
 0x343   :  { %v722_v32 = vadd.f32 1e-05, %v721_v31  ;;  %v1505_v31 = vld [vmem:[#allocation2 + $0x1b8] sm:$0xff]  }
 0x345   :  { %1510 = vrsqrt.f32 %v722_v32  ;;  %v1195_v32 = vld [vmem:[%s1789_s3 + $0xe] ss:$0 sm:$0xff] }
 0x346   :  { %1512 = vpow2.f32 %v738_v34 }
 0x34f   :  { %v1511_v36 = vpop.eup %1510 }
 0x350   :  { %v724_v39 = vmul.f32 %v1511_v36, %v713_v21  ;;  %v1513_v45 = vpop.eup %1512 }
 0x352   :  { %v730_v41 = vmul.f32 %v1182_v37, %v724_v39 }
 0x354   :  { %v736_v43 = vadd.f32 %v1183_v40, %v730_v41  ;;  %v1204_v40 = vld [vmem:[%s1789_s3 + $0xf] ss:$0 sm:$0xff] }
 0x356   :  { %v737_v44 = vadd.f32 %v736_v43, %v337_v42 }
 0x358   :  { %v740_v46 = vmul.f32 %v1513_v45, %v737_v44 }
 0x35a   :  { %v741_v47 = vpack.c.bf16 %v740_v46, %v740_v46 }
 0x35c   :  { %1373 = vmatmul.mubr.bf16.vlgmr.msra.gmra.mrb[8].mxu1 %v741_v47 }
 0x35d   :  { %1412 = vmatprep.mubr.msk.bf16.mxu1 %vm1595_vm0, %v1594_v0  ;;  %1397 = vmatpush3.bf16.msra.mxu1 %v1498_v56 }
 0x35e   :  { %1398 = vmatprep.subr.bf16.mxu1 %v1594_v0 }
 0x361   :  { %1399 = vmatpush3.bf16.msra.mxu1 %v1499_v57 }
 0x362   :  { %1400 = vmatprep.subr.bf16.mxu1 %v1594_v0 }
 0x365   :  { %1401 = vmatpush3.bf16.msra.mxu1 %v1500_v58 }
 0x366   :  { %1402 = vmatprep.subr.bf16.mxu1 %v1594_v0 }
 0x369   :  { %1403 = vmatpush3.bf16.msra.mxu1 %v1501_v59 }
 0x36a   :  { %1404 = vmatprep.subr.bf16.mxu1 %v1594_v0 }
 0x36d   :  { %1405 = vmatpush3.bf16.msra.mxu1 %v1502_v60 }
 0x36e   :  { %1406 = vmatprep.subr.bf16.mxu1 %v1594_v0 }
 0x371   :  { %1407 = vmatpush3.bf16.msra.mxu1 %v1503_v61 }
 0x372   :  { %1408 = vmatprep.subr.bf16.mxu1 %v1594_v0 }
 0x375   :  { %1409 = vmatpush3.bf16.msra.mxu1 %v1504_v30 }
 0x376   :  { %1410 = vmatprep.subr.bf16.mxu1 %v1594_v0 }
 0x379   :  { %1411 = vmatpush3.bf16.msra.mxu1 %v1505_v31 }
 0x42f   :  { %v846_v63 = vpop.f32.mrb[8].mxu1 }
 0x430   :  { %v847_v1 = vadd.f32 %v1184_v62, %v846_v63  ;;  %v1374_v2 = vpop.f32.mrb[9].mxu1 }
 0x431   :  { %v849_v3 = vpop.f32.mrb[10].mxu1 }
 0x432   :  { %v852_v4 = vmax.f32 %v847_v1, 0.0  ;;  %v1375_v5 = vpop.f32.mrb[11].mxu1 }
 0x434   :  { %v853_v6 = vrot.slane %v852_v4, 4 }
 0x436   :  { %v854_v7 = vadd.f32 %v853_v6, %v852_v4 }
 0x438   :  { %v855_v8 = vrot.slane %v854_v7, 2 }
 0x43a   :  { %v856_v9 = vadd.f32 %v855_v8, %v854_v7 }
 0x43c   :  { %v857_v10 = vrot.slane %v856_v9, 1 }
 0x43e   :  { %v858_v11 = vadd.f32 %v857_v10, %v856_v9 }
 0x440   :  { %v859_v12 = vmul.f32 0.125, %v858_v11 }
 0x442   :  { %v860_v13 = vsub.f32 %v852_v4, %v859_v12 }
 0x444   :  { %v861_v14 = vmul.f32 %v860_v13, %v860_v13 }
 0x446   :  { %v862_v15 = vrot.slane %v861_v14, 4 }
 0x448   :  { %v863_v16 = vadd.f32 %v862_v15, %v861_v14 }
 0x44a   :  { %v864_v17 = vrot.slane %v863_v16, 2 }
 0x44c   :  { %v865_v18 = vadd.f32 %v864_v17, %v863_v16 }
 0x44e   :  { %v866_v19 = vrot.slane %v865_v18, 1 }
 0x450   :  { %v867_v20 = vadd.f32 %v866_v19, %v865_v18 }
 0x452   :  { %v868_v21 = vmul.f32 0.125, %v867_v20 }
 0x454   :  { %v869_v22 = vadd.f32 1e-05, %v868_v21 }
 0x456   :  { %1514 = vrsqrt.f32 %v869_v22 }
 0x460   :  { %v1515_v23 = vpop.eup %1514 }
 0x461   :  { %v871_v25 = vmul.f32 %v1515_v23, %v860_v13 }
 0x463   :  { %v877_v27 = vmul.f32 %v1193_v24, %v871_v25 }
 0x465   :  { %v883_v28 = vadd.f32 %v1194_v26, %v877_v27 }
 0x467   :  { %v884_v29 = vpack.c.bf16 %v883_v28, %v883_v28 }
 0x469   :  { %1393 = vmatmul.mubr.bf16.vlgmr.msra.gmra.mrb[12].mxu0 %v884_v29 }
 0x53c   :  { %v989_v33 = vpop.f32.mrb[12].mxu0 }
 0x53d   :  { %v990_v34 = vadd.f32 %v1195_v32, %v989_v33  ;;  %v1394_v35 = vpop.f32.mrb[13].mxu0 }
 0x53e   :  { %v992_v36 = vpop.f32.mrb[14].mxu0 }
 0x53f   :  { %v995_v37 = vmax.f32 %v990_v34, 0.0  ;;  %v1395_v38 = vpop.f32.mrb[15].mxu0 }
 0x541   :  { %v996_v39 = vpack.c.bf16 %v995_v37, %v995_v37 }
 0x543   :  { %1413 = vmatmul.mubr.bf16.vlgmr.msra.gmra.mrb[12].mxu1 %v996_v39 }
 0x616   :  { %v1101_v0 = vpop.f32.mrb[12].mxu1 }
 0x617   :  { %v1102_v41 = vadd.f32 %v1204_v40, %v1101_v0  ;;  %v1414_v42 = vpop.f32.mrb[13].mxu1 }
 0x618   :  { %v1104_v43 = vpop.f32.mrb[14].mxu1 }
 0x619   :  { %1107 = vst [vmem:[#allocation7] sm:$0xff] %v1102_v41  ;;  %v1415_v44 = vpop.f32.mrb[15].mxu1 }
 0x61a   :  { %1571 = shalt.err (!%p1568_p6)
}
 0x61b   :  { %s1572_s3 = scalar_lea.hbm %s1790_s4, 128 }
 0x61c   :  { %p1573_p7 = scmp.ne.s32.totalorder %s1790_s4, %s1572_s3  ;;  %p1576_p8 = scmp.lt.u32.totalorder %s1572_s3, %s1790_s4 }
 0x61e   :  { %p1578_p9 = pnand %p1576_p8, %p1573_p7 }
 0x620   :  { %1581 = shalt.err (!%p1578_p9)
}
 0x621   :  { %1117 = dma.vmem_to_hbm [thread:$0]  %s1115_s22, 128, %s1790_s4, [#allocation4]  }
 0x622   :  { %1586 = dma.done.wait [#allocation4], 128  }
 0x623   :  { %1587 = vsyncadd [#allocation4], 4294967168 }
 0x624   :  { %1121 = vsyncpa [#allocation3], 1 }
 0x625   :  { %1122 = vsyncpa [#allocation6], 1 }
 0x626   :  { %1123 = vsyncpa [#allocation4], 1 }

</bundles_post_ra>
